<compile_context>
chip_gen: v7x
topology: tpu7x:2x2x1
jax: 0.10.0
libtpu: 0.0.40
codegen_flags: <defaults>
</compile_context>

<pallas_src>
import math

import jax
import jax.numpy as jnp
from jax import lax
from jax.experimental import pallas as pl
from jax.experimental.pallas import tpu as pltpu


def _value_kernel(x_ref, w1_ref, b1_ref, w2_ref, b2_ref, wv_ref, bv_ref, o_ref):
    """Fused 3-layer MLP on one batch tile.

    x_ref  : (TB, D)  bf16   (batch tile of states)
    w1_ref : (D, H)   bf16   (resident)
    b1_ref : (1, H)   f32    (resident)
    w2_ref : (H, H)   bf16   (resident)
    b2_ref : (1, H)   f32    (resident)
    wv_ref : (1, H)   bf16   (resident, value head as a row)
    bv_ref : (1,)     f32    (SMEM scalar)
    o_ref  : (1, TB)  f32    (lane-dense output row: batch on the lane axis)
    """
    x = x_ref[...]

    # Layer 1: MXU matmul (bf16 in, f32 acc) + f32 bias/ReLU on the VPU.
    h1 = jnp.dot(x, w1_ref[...], preferred_element_type=jnp.float32)
    h1 = jnp.maximum(h1 + b1_ref[...], 0.0)                       # (TB, H) f32

    # Layer 2: cast activations to bf16 only for the MXU input.
    h2 = jnp.dot(h1.astype(jnp.bfloat16), w2_ref[...],
                 preferred_element_type=jnp.float32)
    h2 = jnp.maximum(h2 + b2_ref[...], 0.0)                       # (TB, H) f32

    # Value head: (1,H) x (TB,H) contracting H -> (1, TB).
    # Produces the result directly lane-dense (batch along lanes), so the
    # store is a full-lane vst instead of a masked 1-lane column write.
    v = lax.dot_general(wv_ref[...], h2.astype(jnp.bfloat16),
                        dimension_numbers=(((1,), (1,)), ((), ())),
                        preferred_element_type=jnp.float32)       # (1, TB) f32

    o_ref[...] = (v + bv_ref[0]).astype(o_ref.dtype)


def value_forward(state, params, *, batch_tile=512):
    """state: (B, D) f32. params: dict of w1,b1,w2,b2,wv,bv. Returns (B, 1) f32."""
    B, D = state.shape
    H = params["w1"].shape[1]

    # Batch tiling: single full tile for small batches, 512-row tiles (padded)
    # for large batches so the activation DMA pipelines against the MXU work.
    if B <= batch_tile:
        TB, B_pad = B, B
    else:
        TB = batch_tile
        B_pad = ((B + TB - 1) // TB) * TB
    G = B_pad // TB

    x = state
    if B_pad != B:
        x = jnp.pad(x, ((0, B_pad - B), (0, 0)))

    # bf16 MXU inputs (f32 accumulation requested inside the kernel).
    x_bf = x.astype(jnp.bfloat16)
    w1 = params["w1"].astype(jnp.bfloat16)
    w2 = params["w2"].astype(jnp.bfloat16)
    wv_row = params["wv"].reshape(1, H).astype(jnp.bfloat16)   # (H,1) -> (1,H)
    b1 = params["b1"]
    b2 = params["b2"]
    bv = params["bv"].reshape((1,))                            # scalar via SMEM

    # Weights/biases: constant block index across the batch grid -> resident.
    resident = lambda shape: pl.BlockSpec(shape, lambda i: (0,) * len(shape))

    out_row = pl.pallas_call(
        _value_kernel,
        out_shape=jax.ShapeDtypeStruct((1, B_pad), jnp.float32),
        grid_spec=pltpu.PrefetchScalarGridSpec(
            num_scalar_prefetch=0,
            grid=(G,),
            in_specs=[
                pl.BlockSpec((TB, D), lambda i: (i, 0)),               # state tile
                resident((D, H)),                                      # w1
                resident((1, H)),                                      # b1
                resident((H, H)),                                      # w2
                resident((1, H)),                                      # b2
                resident((1, H)),                                      # wv row
                pl.BlockSpec(memory_space=pltpu.MemorySpace.SMEM),     # bv scalar
            ],
            out_specs=pl.BlockSpec((1, TB), lambda i: (0, i)),         # lane-dense
        ),
        compiler_params=pltpu.CompilerParams(
            # Batch axis is independent -> shardable across v7x's 2 TensorCores.
            dimension_semantics=("parallel",),
        ),
        # NOTE: at these sizes VMEM is far under the default scoped limit; if H
        # or TB is scaled up, budget with vmem_limit_bytes (v7x has 64 MiB).
    )(x_bf, w1, b1, w2, b2, wv_row, bv)

    return out_row[0, :B].reshape(B, 1)


def init_value_params(key, input_dim, layer_neurons):
    """Mimics torch.nn.Linear default init: U[-1/sqrt(fan_in), 1/sqrt(fan_in)]."""
    ks = jax.random.split(key, 6)

    def linear(kw, kb, fan_in, fan_out):
        bound = 1.0 / math.sqrt(fan_in)
        w = jax.random.uniform(kw, (fan_in, fan_out), jnp.float32, -bound, bound)
        b = jax.random.uniform(kb, (1, fan_out), jnp.float32, -bound, bound)
        return w, b

    w1, b1 = linear(ks[0], ks[1], input_dim, layer_neurons)
    w2, b2 = linear(ks[2], ks[3], layer_neurons, layer_neurons)
    wv, bv = linear(ks[4], ks[5], layer_neurons, 1)
    return {"w1": w1, "b1": b1, "w2": w2, "b2": b2, "wv": wv, "bv": bv}


def _reference(state, params):
    h1 = jnp.maximum(state @ params["w1"] + params["b1"], 0.0)
    h2 = jnp.maximum(h1 @ params["w2"] + params["b2"], 0.0)
    return h2 @ params["wv"] + params["bv"]


if __name__ == "__main__":
    key = jax.random.PRNGKey(0)
    k_params, k_state, k_big = jax.random.split(key, 3)

    batch = 8          # small batch of states
    input_dim = 16     # state-space dimension (input_shape = (16,))
    layer_neurons = 32 # hidden width
    # NOTE: H=32 uses only 32/128 lanes; if the hyperparameter is flexible,
    # prefer H (and D) as multiples of 128 for full MXU/lane occupancy.

    params = init_value_params(k_params, input_dim, layer_neurons)

    # --- small-batch check (single tile) ---
    state = jax.random.normal(k_state, (batch, input_dim), jnp.float32)
    value = value_forward(state, params)
    jax.block_until_ready(value)
    ref = _reference(state, params)
    assert value.shape == (batch, 1)
    # bf16 MXU inputs (f32 accumulation) -> compare against f32 reference
    # with a bf16-appropriate tolerance.
    assert jnp.allclose(value, ref, atol=3e-2, rtol=3e-2), (
        float(jnp.max(jnp.abs(value - ref))))

    # --- multi-tile check (exercises the batch grid + padding path) ---
    big_batch = 600    # pads to 1024 -> grid of 2 batch tiles of 512
    state_big = jax.random.normal(k_big, (big_batch, input_dim), jnp.float32)
    value_big = value_forward(state_big, params)
    jax.block_until_ready(value_big)
    ref_big = _reference(state_big, params)
    assert value_big.shape == (big_batch, 1)
    assert jnp.allclose(value_big, ref_big, atol=3e-2, rtol=3e-2), (
        float(jnp.max(jnp.abs(value_big - ref_big))))

    print("KERNEL_OK")
</pallas_src>

<mosaic_0001>
module attributes {stable_mosaic.version = 11 : i64} {
  func.func @_value_kernel(%arg0: i32, %arg1: memref<8x16xbf16, #tpu.memory_space<vmem>>, %arg2: memref<16x32xbf16, #tpu.memory_space<vmem>>, %arg3: memref<1x32xf32, #tpu.memory_space<vmem>>, %arg4: memref<32x32xbf16, #tpu.memory_space<vmem>>, %arg5: memref<1x32xf32, #tpu.memory_space<vmem>>, %arg6: memref<1x32xbf16, #tpu.memory_space<vmem>>, %arg7: memref<1xf32, #tpu.memory_space<smem>>, %arg8: memref<1x8xf32, #tpu.memory_space<vmem>>) attributes {dimension_semantics = [#tpu.dimension_semantics<parallel>], iteration_bounds = array<i64: 1>, scalar_prefetch = 0 : i64, scratch_operands = 0 : i64, tpu.core_type = #tpu.core_type<tc>, window_params = [{transform_indices = @transform_0, window_bounds = array<i64: 8, 16>}, {pipeline_mode = #tpu.pipeline_mode<synchronous>, transform_indices = @transform_1, window_bounds = array<i64: 16, 32>}, {pipeline_mode = #tpu.pipeline_mode<synchronous>, transform_indices = @transform_2, window_bounds = array<i64: 1, 32>}, {pipeline_mode = #tpu.pipeline_mode<synchronous>, transform_indices = @transform_3, window_bounds = array<i64: 32, 32>}, {pipeline_mode = #tpu.pipeline_mode<synchronous>, transform_indices = @transform_4, window_bounds = array<i64: 1, 32>}, {pipeline_mode = #tpu.pipeline_mode<synchronous>, transform_indices = @transform_5, window_bounds = array<i64: 1, 32>}, {transform_indices = @transform_6, window_bounds = array<i64: 1>}, {transform_indices = @transform_7, window_bounds = array<i64: 1, 8>}]} {
    %c0 = arith.constant 0 : index
    %c0_0 = arith.constant 0 : index
    %0 = vector.load %arg1[%c0, %c0_0] : memref<8x16xbf16, #tpu.memory_space<vmem>>, vector<8x16xbf16>
    %c0_1 = arith.constant 0 : index
    %c0_2 = arith.constant 0 : index
    %1 = vector.load %arg2[%c0_1, %c0_2] : memref<16x32xbf16, #tpu.memory_space<vmem>>, vector<16x32xbf16>
    %cst = arith.constant dense<0.000000e+00> : vector<8x32xf32>
    %2 = tpu.matmul %0, %1, %cst {dimension_numbers = #tpu.dot_dimension_numbers<[1], [0], [0], [1], [0, 0, 1, 1], [], []>} : vector<8x16xbf16>, vector<16x32xbf16>, vector<8x32xf32> -> vector<8x32xf32>
    %c0_3 = arith.constant 0 : index
    %c0_4 = arith.constant 0 : index
    %3 = vector.load %arg3[%c0_3, %c0_4] : memref<1x32xf32, #tpu.memory_space<vmem>>, vector<1x32xf32>
    %4 = vector.broadcast %3 : vector<1x32xf32> to vector<8x32xf32>
    %5 = arith.addf %2, %4 : vector<8x32xf32>
    %cst_5 = arith.constant 0.000000e+00 : f32
    %6 = vector.broadcast %cst_5 : f32 to vector<8x32xf32>
    %7 = arith.maximumf %5, %6 : vector<8x32xf32>
    %8 = arith.truncf %7 : vector<8x32xf32> to vector<8x32xbf16>
    %c0_6 = arith.constant 0 : index
    %c0_7 = arith.constant 0 : index
    %9 = vector.load %arg4[%c0_6, %c0_7] : memref<32x32xbf16, #tpu.memory_space<vmem>>, vector<32x32xbf16>
    %cst_8 = arith.constant dense<0.000000e+00> : vector<8x32xf32>
    %10 = tpu.matmul %8, %9, %cst_8 {dimension_numbers = #tpu.dot_dimension_numbers<[1], [0], [0], [1], [0, 0, 1, 1], [], []>} : vector<8x32xbf16>, vector<32x32xbf16>, vector<8x32xf32> -> vector<8x32xf32>
    %c0_9 = arith.constant 0 : index
    %c0_10 = arith.constant 0 : index
    %11 = vector.load %arg5[%c0_9, %c0_10] : memref<1x32xf32, #tpu.memory_space<vmem>>, vector<1x32xf32>
    %12 = vector.broadcast %11 : vector<1x32xf32> to vector<8x32xf32>
    %13 = arith.addf %10, %12 : vector<8x32xf32>
    %cst_11 = arith.constant 0.000000e+00 : f32
    %14 = vector.broadcast %cst_11 : f32 to vector<8x32xf32>
    %15 = arith.maximumf %13, %14 : vector<8x32xf32>
    %c0_12 = arith.constant 0 : index
    %c0_13 = arith.constant 0 : index
    %16 = vector.load %arg6[%c0_12, %c0_13] : memref<1x32xbf16, #tpu.memory_space<vmem>>, vector<1x32xbf16>
    %17 = arith.truncf %15 : vector<8x32xf32> to vector<8x32xbf16>
    %cst_14 = arith.constant dense<0.000000e+00> : vector<1x8xf32>
    %18 = tpu.matmul %16, %17, %cst_14 {dimension_numbers = #tpu.dot_dimension_numbers<[1], [1], [0], [0], [0, 0, 1, 0], [], []>} : vector<1x32xbf16>, vector<8x32xbf16>, vector<1x8xf32> -> vector<1x8xf32>
    %c0_15 = arith.constant 0 : index
    %19 = memref.load %arg7[%c0_15] : memref<1xf32, #tpu.memory_space<smem>>
    %20 = vector.broadcast %19 : f32 to vector<1x8xf32>
    %21 = arith.addf %18, %20 : vector<1x8xf32>
    %c0_16 = arith.constant 0 : index
    %c0_17 = arith.constant 0 : index
    %22 = vector.load %arg8[%c0_16, %c0_17] : memref<1x8xf32, #tpu.memory_space<vmem>>, vector<1x8xf32>
    tpu.vector_store %arg8[%c0_16, %c0_17], %21 {strides = array<i32>} : memref<1x8xf32, #tpu.memory_space<vmem>>, vector<1x8xf32>,
    return
  }
  func.func @transform_0(%arg0: i32) -> (i32, i32) {
    %c0_i32 = arith.constant 0 : i32
    %c0_i32_0 = arith.constant 0 : i32
    return %arg0, %c0_i32 : i32, i32
  }
  func.func @transform_1(%arg0: i32) -> (i32, i32) {
    %c0_i32 = arith.constant 0 : i32
    %c0_i32_0 = arith.constant 0 : i32
    %c0_i32_1 = arith.constant 0 : i32
    return %c0_i32, %c0_i32_0 : i32, i32
  }
  func.func @transform_2(%arg0: i32) -> (i32, i32) {
    %c0_i32 = arith.constant 0 : i32
    %c0_i32_0 = arith.constant 0 : i32
    %c0_i32_1 = arith.constant 0 : i32
    return %c0_i32, %c0_i32_0 : i32, i32
  }
  func.func @transform_3(%arg0: i32) -> (i32, i32) {
    %c0_i32 = arith.constant 0 : i32
    %c0_i32_0 = arith.constant 0 : i32
    %c0_i32_1 = arith.constant 0 : i32
    return %c0_i32, %c0_i32_0 : i32, i32
  }
  func.func @transform_4(%arg0: i32) -> (i32, i32) {
    %c0_i32 = arith.constant 0 : i32
    %c0_i32_0 = arith.constant 0 : i32
    %c0_i32_1 = arith.constant 0 : i32
    return %c0_i32, %c0_i32_0 : i32, i32
  }
  func.func @transform_5(%arg0: i32) -> (i32, i32) {
    %c0_i32 = arith.constant 0 : i32
    %c0_i32_0 = arith.constant 0 : i32
    %c0_i32_1 = arith.constant 0 : i32
    return %c0_i32, %c0_i32_0 : i32, i32
  }
  func.func @transform_6(%arg0: i32) -> i32 {
    %c0_i32 = arith.constant 0 : i32
    %c0_i32_0 = arith.constant 0 : i32
    return %c0_i32 : i32
  }
  func.func @transform_7(%arg0: i32) -> (i32, i32) {
    %c0_i32 = arith.constant 0 : i32
    %c0_i32_0 = arith.constant 0 : i32
    return %c0_i32, %arg0 : i32, i32
  }
}

</mosaic_0001>

<bundles_post_ra>
// kernel: tpu_custom_call.1
= control target key start
LH: loop header
LB: loop body
LE: loop exit
PB: predicated region body
PF: predicated region fallthrough
CT: control target
= control target key end

     0   :  { %13 = vsyncpa [#allocation4], 0  ;;  %s520_s0 = inlined_call_operand.hbm [shape: bf16[8,16], index: 0, kind: input, shape index: {}]   ;;  %s521_s1 = inlined_call_operand.hbm [shape: bf16[16,32], index: 1, kind: input, shape index: {}]   ;;  %s522_s2 = inlined_call_operand.vmem [shape: f32[1,32], index: 2, kind: input, shape index: {}]   ;;  %s523_s3 = inlined_call_operand.hbm [shape: bf16[32,32], index: 3, kind: input, shape index: {}]   ;;  %s524_s4 = inlined_call_operand.vmem [shape: f32[1,32], index: 4, kind: input, shape index: {}]   ;;  %s525_s5 = inlined_call_operand.vmem [shape: bf16[1,32], index: 5, kind: input, shape index: {}]   ;;  %s526_s6 = inlined_call_operand.<no memory space> [shape: f32[1], index: 6, kind: input, shape index: {}]   ;;  %s527_s7 = inlined_call_operand.hbm [shape: f32[1,8], index: 7, kind: output, shape index: {}]  }
   0x1   :  { %14 = vsyncpa [#allocation7], 0 }
   0x2   :  { %15 = vsyncpa [#allocation5], 0  ;;  %s406_s24 = smov [#allocation6]   ;;  %s312_s28 = scalar_lea.hbm %s521_s1, 128 }
   0x3   :  { %s31_s25 = sshll.u32 %s406_s24, 4  ;;  %p313_p0 = scmp.ne.s32.totalorder %s521_s1, %s312_s28  ;;  %s32_s25 = int_to_ptr.vmem [resolvable:$true] %s31_s25 }
   0x4   :  { %p316_p1 = scmp.lt.u32.totalorder %s312_s28, %s521_s1 }
   0x6   :  { %p318_p2 = pnand %p316_p1, %p313_p0 }
   0x8   :  { %321 = shalt.err (!%p318_p2)
}
   0x9   :  { %s322_s10 = scalar_lea.vmem %s32_s25, 128  ;;  %p327_p4 = scmp.lt.s32.totalorder %s32_s25, %s32_s25 }
   0xa   :  { %p323_p3 = scmp.ne.s32.totalorder %s32_s25, %s322_s10  ;;  %p328_p5 = scmp.lt.s32.totalorder %s322_s10, %s322_s10 }
   0xc   :  { %p329_p6 = por %p328_p5, %p327_p4 }
   0xe   :  { %p330_p7 = pnand %p329_p6, %p323_p3 }
  0x10   :  { %333 = shalt.err (!%p330_p7)
}
  0x11   :  { %s407_s11 = smov 64   ;;  %s408_s12 = smov 4  }
  0x12   :  { %37 = dma.hbm_to_vmem [thread:$0]  %s521_s1, 128, %s32_s25, [#allocation7], %s407_s11, %s407_s11, %s408_s12  }
  0x13   :  { %s409_s15 = smov [#allocation3]   ;;  %s410_s17 = smov [#allocation8]  }
  0x14   :  { %s22_s16 = sshll.u32 %s409_s15, 4  ;;  %s45_s18 = sshll.u32 %s410_s17, 4  ;;  %s23_s16 = int_to_ptr.vmem [resolvable:$true] %s22_s16  ;;  %s46_s18 = int_to_ptr.vmem [resolvable:$true] %s45_s18 }
  0x15   :  { %s334_s21 = scalar_lea.hbm %s520_s0, 64 }
  0x16   :  { %p335_p8 = scmp.ne.s32.totalorder %s520_s0, %s334_s21  ;;  %p338_p9 = scmp.lt.u32.totalorder %s334_s21, %s520_s0 }
  0x18   :  { %p340_p10 = pnand %p338_p9, %p335_p8 }
  0x1a   :  { %343 = shalt.err (!%p340_p10)
}
  0x1b   :  { %s344_s1 = scalar_lea.vmem %s23_s16, 64  ;;  %p349_p12 = scmp.lt.s32.totalorder %s23_s16, %s23_s16 }
  0x1c   :  { %p345_p11 = scmp.ne.s32.totalorder %s23_s16, %s344_s1  ;;  %p350_p13 = scmp.lt.s32.totalorder %s344_s1, %s344_s1 }
  0x1e   :  { %p351_p0 = por %p350_p13, %p349_p12 }
  0x20   :  { %p352_p1 = pnand %p351_p0, %p345_p11 }
  0x22   :  { %355 = shalt.err (!%p352_p1)
}
  0x23   :  { %25 = dma.hbm_to_vmem [thread:$0]  %s520_s0, 64, %s23_s16, [#allocation4]  }
  0x24   :  { %s356_s30 = scalar_lea.hbm %s523_s3, 256 }
  0x25   :  { %p357_p2 = scmp.ne.s32.totalorder %s523_s3, %s356_s30  ;;  %p360_p3 = scmp.lt.u32.totalorder %s356_s30, %s523_s3 }
  0x27   :  { %p362_p4 = pnand %p360_p3, %p357_p2 }
  0x29   :  { %365 = shalt.err (!%p362_p4)
}
  0x2a   :  { %s366_s14 = scalar_lea.vmem %s46_s18, 256  ;;  %p371_p6 = scmp.lt.s32.totalorder %s46_s18, %s46_s18 }
  0x2b   :  { %p367_p5 = scmp.ne.s32.totalorder %s46_s18, %s366_s14  ;;  %p372_p7 = scmp.lt.s32.totalorder %s366_s14, %s366_s14 }
  0x2d   :  { %p373_p8 = por %p372_p7, %p371_p6 }
  0x2f   :  { %p374_p9 = pnand %p373_p8, %p367_p5 }
  0x31   :  { %377 = shalt.err (!%p374_p9)
}
  0x32   :  { %51 = dma.hbm_to_vmem [thread:$0]  %s523_s3, 256, %s46_s18, [#allocation7], %s407_s11, %s407_s11, %s408_s12  }
  0x33   :  { %400 = dma.done.wait [#allocation4], 64  }
  0x34   :  { %401 = vsyncadd [#allocation4], 4294967232 }
  0x35   :  { %402 = dma.done.wait [#allocation7], 384  }
  0x36   :  { %403 = vsyncadd [#allocation7], 4294966912  ;;  %v411_v0 = vmov 0.0   ;;  %vm412_vm0 = vmmov 0   ;;  %v309_v1 = vld [vmem:[#allocation6] sm:$0xff]   ;;  %vm84_vm1 = vcmask 130048   ;;  %v201_v23 = vstv %s526_s6 }
  0x37   :  { %281 = vmatprep.subr.bf16.mxu0 %v411_v0  ;;  %283 = vmatprep.mubr.msk.bf16.mxu0 %vm412_vm0, %v411_v0  ;;  %v68_v2 = vld [vmem:[#allocation3] sm:$0xf]  ;;  %v310_v3 = vld [vmem:[#allocation8] sm:$0xff]   ;;  %v311_v4 = vld [vmem:[#allocation8 + $0x8] sm:$0xff]   ;;  %vm153_vm2 = vcmask 261120   ;;  %s413_s20 = smov [#allocation9]  }
  0x38   :  { %287 = vmatprep.subr.bf16.mxu1 %v411_v0  ;;  %291 = vmatprep.mubr.msk.bf16.mxu1 %vm412_vm0, %v411_v0  ;;  %v266_v5 = vld [vmem:[%s522_s2] ss:$0 sm:$0xff]  ;;  %vm248_vm3 = vcmask 57344  }
  0x39   :  { %282 = vmatpush3.bf16.msra.mxu0 %v309_v1  ;;  %288 = vmatpush3.bf16.msra.mxu1 %v310_v3  ;;  %v269_v13 = vld [vmem:[%s524_s4] ss:$0 sm:$0xff]  ;;  %s256_s4 = sshll.u32 %s413_s20, 4  ;;  %s257_s4 = int_to_ptr.vmem [resolvable:$true] %s256_s4 }
  0x3a   :  { %295 = vmatprep.subr.bf16.mxu0 %v411_v0  ;;  %289 = vmatprep.subr.bf16.mxu1 %v411_v0  ;;  %v198_v22 = vld [vmem:[%s525_s5] sm:$0x1]  ;;  %s378_s21 = scalar_lea.vmem %s257_s4, 16  ;;  %s382_s22 = scalar_lea.vmem %s257_s4, 32 }
  0x3b   :  { %p379_p10 = scmp.ne.s32.totalorder %s257_s4, %s378_s21  ;;  %p383_p11 = scmp.lt.s32.totalorder %s257_s4, %s257_s4 }
  0x3c   :  { %284 = vmatmul.mubr.msk.bf16.vlgmr.msra.gmra.mrb[0].mxu0 %vm84_vm1, %v68_v2  ;;  %p384_p12 = scmp.lt.s32.totalorder %s382_s22, %s378_s21 }
  0x3d   :  { %297 = vmatprep.mubr.msk.bf16.mxu0 %vm412_vm0, %v411_v0  ;;  %290 = vmatpush3.bf16.msra.mxu1 %v311_v4 }
  0x3e   :  { %p385_p13 = por %p384_p12, %p383_p11 }
  0x40   :  { %p386_p0 = pnand %p385_p13, %p379_p10 }
 0x10f   :  { %v122_v6 = vpop.f32.mrb[0].mxu0 }
 0x110   :  { %v123_v7 = vadd.f32 %v266_v5, %v122_v6  ;;  %v285_v8 = vpop.f32.mrb[1].mxu0 }
 0x111   :  { %v125_v9 = vpop.f32.mrb[2].mxu0 }
 0x112   :  { %v128_v10 = vmax.f32 %v123_v7, 0.0  ;;  %v286_v11 = vpop.f32.mrb[3].mxu0 }
 0x114   :  { %v129_v12 = vpack.c.bf16 %v128_v10, %v128_v10 }
 0x116   :  { %292 = vmatmul.mubr.msk.bf16.vlgmr.msra.gmra.mrb[0].mxu1 %vm153_vm2, %v129_v12 }
 0x1e9   :  { %v191_v14 = vpop.f32.mrb[0].mxu1 }
 0x1ea   :  { %v192_v15 = vadd.f32 %v269_v13, %v191_v14  ;;  %v293_v16 = vpop.f32.mrb[1].mxu1 }
 0x1eb   :  { %v194_v17 = vpop.f32.mrb[2].mxu1 }
 0x1ec   :  { %v197_v18 = vmax.f32 %v192_v15, 0.0  ;;  %v294_v19 = vpop.f32.mrb[3].mxu1 }
 0x1ee   :  { %v199_v20 = vpack.c.bf16 %v197_v18, %v197_v18 }
 0x1f0   :  { %v206_v21 = vsel %vm153_vm2, %v199_v20, 0 }
 0x1f1   :  { %296 = vmatpush3.bf16.xpose.msra.mxu0 %v206_v21 }
 0x1f8   :  { %298 = vmatmul.mubr.msk.bf16.vlgmr.msra.gmra.mrb[4].mxu0 %vm153_vm2, %v198_v22 }
 0x2cb   :  { %v242_v24 = vpop.f32.mrb[4].mxu0 }
 0x2cc   :  { %v243_v25 = vadd.f32 %v242_v24, %v201_v23  ;;  %v299_v26 = vpop.f32.mrb[5].mxu0 }
 0x2cd   :  { %v245_v27 = vpop.f32.mrb[6].mxu0 }
 0x2ce   :  { %v300_v28 = vpop.f32.mrb[7].mxu0  ;;  %249 = vst.msk [vmem:[#allocation9] sm:$0x1] %vm248_vm3, %v243_v25 }
 0x2cf   :  { %389 = shalt.err (!%p386_p0)
}
 0x2d0   :  { %s390_s23 = scalar_lea.hbm %s527_s7, 16 }
 0x2d1   :  { %p391_p1 = scmp.ne.s32.totalorder %s527_s7, %s390_s23  ;;  %p394_p2 = scmp.lt.u32.totalorder %s390_s23, %s527_s7 }
 0x2d3   :  { %p396_p3 = pnand %p394_p2, %p391_p1 }
 0x2d5   :  { %399 = shalt.err (!%p396_p3)
}
 0x2d6   :  { %259 = dma.vmem_to_hbm [thread:$0]  %s257_s4, 16, %s527_s7, [#allocation5]  }
 0x2d7   :  { %404 = dma.done.wait [#allocation5], 16  }
 0x2d8   :  { %405 = vsyncadd [#allocation5], 4294967280 }
 0x2d9   :  { %263 = vsyncpa [#allocation4], 1 }
 0x2da   :  { %264 = vsyncpa [#allocation7], 1 }
 0x2db   :  { %265 = vsyncpa [#allocation5], 1 }

</bundles_post_ra>
